<compile_context>
chip_gen: v7x
topology: tpu7x:2x2x1
jax: 0.10.0
libtpu: 0.0.40
codegen_flags: <defaults>
</compile_context>

<pallas_src>
from functools import partial

import jax
import jax.numpy as jnp
from jax.experimental import pallas as pl
from jax.experimental.pallas import tpu as pltpu


def _round_up(x, m):
    return ((x + m - 1) // m) * m


def _critic_kernel(ln_eps, hidden_dim,
                   obs_ref, act_ref,
                   wt_ref, bt_ref, g_ref, beta_ref,
                   w1h_ref, w1a_ref, b1_ref,
                   w21_ref, b21_ref, w31_ref, b31_ref,
                   w22_ref, b22_ref, w32_ref, b32_ref,
                   q_ref, acc_ref):
    """Grid = (batch tiles, repr_dim tiles).

    acc_ref accumulates the trunk matmul in f32 across the K axis; LayerNorm,
    Tanh and both Q heads run once per row tile, on the last K step.
    """
    k = pl.program_id(1)

    @pl.when(k == 0)
    def _():
        acc_ref[...] = jnp.zeros_like(acc_ref)

    # Trunk matmul: bf16 (or f32) inputs, f32 accumulation on the MXU.
    acc_ref[...] += jnp.dot(obs_ref[...], wt_ref[...],
                            preferred_element_type=jnp.float32)

    @pl.when(k == pl.num_programs(1) - 1)
    def _():
        cdt = w1h_ref.dtype            # compute dtype fed to the MXU

        # ---- LayerNorm + Tanh in f32 ---------------------------------------
        h = acc_ref[...] + bt_ref[...]
        mu = jnp.mean(h, axis=-1, keepdims=True)
        xc = h - mu
        var = jnp.mean(xc * xc, axis=-1, keepdims=True)
        h = xc * jax.lax.rsqrt(var + ln_eps) * g_ref[...] + beta_ref[...]
        h = jnp.tanh(h)

        # ---- Both heads' first layers fused into one matmul pair -----------
        # cat([h, action]) eliminated by the weight split done in the wrapper:
        #   ha @ W1 == h @ W1[:F] + action @ W1[F:]
        z = (jnp.dot(h.astype(cdt), w1h_ref[...],
                     preferred_element_type=jnp.float32)
             + jnp.dot(act_ref[...], w1a_ref[...],
                       preferred_element_type=jnp.float32)
             + b1_ref[...])
        z = jnp.maximum(z, 0.0)

        def tail(zh, w2_ref, b2_ref, w3row_ref, b3_ref):
            y = jnp.dot(zh.astype(cdt), w2_ref[...],
                        preferred_element_type=jnp.float32) + b2_ref[...]
            y = jnp.maximum(y, 0.0)
            # Final N=1 layer as VPU multiply + lane reduce (frees the MXU).
            return jnp.sum(y * w3row_ref[...], axis=-1, keepdims=True) + b3_ref[...]

        q1 = tail(z[:, :hidden_dim], w21_ref, b21_ref, w31_ref, b31_ref)
        q2 = tail(z[:, hidden_dim:], w22_ref, b22_ref, w32_ref, b32_ref)

        # Fused (tb, 2) store: one output DMA per grid step instead of two.
        q_ref[...] = jnp.concatenate([q1, q2], axis=-1)


def _resident_spec(shape):
    """Weights/biases use the same block for every grid step -> single-buffer."""
    try:
        return pl.BlockSpec(shape, lambda i, k: (0, 0),
                            pipeline_mode=pl.Buffered(1))
    except TypeError:   # jax versions without the pipeline_mode kwarg
        return pl.BlockSpec(shape, lambda i, k: (0, 0))


def critic_forward(obs, action, params, *, ln_eps=1e-5, tile_b=256, tile_k=2048,
                   compute_dtype=jnp.bfloat16, vmem_limit_mb=48):
    """Critic forward.  obs (B, repr_dim), action (B, A) -> (q1, q2), each (B, 1)."""
    obs = jnp.asarray(obs, jnp.float32)
    action = jnp.asarray(action, jnp.float32)

    B, repr_dim = obs.shape
    A = action.shape[1]
    F = params["trunk_w"].shape[1]
    H = params["q1_w2"].shape[0]

    # ---- batch (row) tile ---------------------------------------------------
    if B >= 2 * tile_b:
        tb = tile_b
    else:
        # Small batch: split across (up to) 2 parallel grid steps so both v7x
        # TensorCores get work.  Irrelevant on v5e/v6e (single TC) but harmless.
        tb = max(8, _round_up(-(-B // 2), 8))
    Bp = _round_up(B, tb)

    # ---- repr_dim (K) tile: keeps the obs tile small on v7x's 64 MiB VMEM ---
    tk = min(_round_up(tile_k, 128), _round_up(repr_dim, 128))
    Kp = _round_up(repr_dim, tk)

    obs_p = obs
    act_p = action
    if Bp != B or Kp != repr_dim:
        obs_p = jnp.pad(obs_p, ((0, Bp - B), (0, Kp - repr_dim)))
    if Bp != B:
        act_p = jnp.pad(act_p, ((0, Bp - B), (0, 0)))
    obs_p = obs_p.astype(compute_dtype)
    act_p = act_p.astype(compute_dtype)

    f32 = lambda x: jnp.asarray(x, jnp.float32)
    row = lambda v: f32(v).reshape(1, -1)        # biases / LN params -> (1, dim) f32
    cdt = compute_dtype

    # Trunk weight (pad K rows with zeros — exact for the matmul).
    wt = f32(params["trunk_w"])
    if Kp != repr_dim:
        wt = jnp.pad(wt, ((0, Kp - repr_dim), (0, 0)))
    wt = wt.astype(cdt)

    # Split + merge the two heads' first-layer weights:
    #   (F+A, H) x2  ->  (F, 2H) and (A, 2H)   (slice boundary at H lanes)
    w1_1 = f32(params["q1_w1"])
    w1_2 = f32(params["q2_w1"])
    w1h = jnp.concatenate([w1_1[:F], w1_2[:F]], axis=1).astype(cdt)
    w1a = jnp.concatenate([w1_1[F:], w1_2[F:]], axis=1).astype(cdt)
    b1 = jnp.concatenate([row(params["q1_b1"]), row(params["q2_b1"])], axis=1)

    weight_args = (
        wt, row(params["trunk_b"]), row(params["ln_g"]), row(params["ln_b"]),
        w1h, w1a, b1,
        f32(params["q1_w2"]).astype(cdt), row(params["q1_b2"]),
        row(params["q1_w3"]), row(params["q1_b3"]),       # w3 as (1, H) f32 row
        f32(params["q2_w2"]).astype(cdt), row(params["q2_b2"]),
        row(params["q2_w3"]), row(params["q2_b3"]),
    )

    in_specs = (
        [pl.BlockSpec((tb, tk), lambda i, k: (i, k)),     # obs tile (row, K)
         pl.BlockSpec((tb, A), lambda i, k: (i, 0))]      # action tile (row)
        + [_resident_spec(w.shape) for w in weight_args]  # resident, 1-buffered
    )
    out_specs = pl.BlockSpec((tb, 2), lambda i, k: (i, 0))

    q = pl.pallas_call(
        partial(_critic_kernel, float(ln_eps), int(H)),   # compile-time scalars
        grid=(Bp // tb, Kp // tk),
        in_specs=in_specs,
        out_specs=out_specs,
        out_shape=jax.ShapeDtypeStruct((Bp, 2), jnp.float32),
        scratch_shapes=[pltpu.VMEM((tb, F), jnp.float32)],   # trunk accumulator
        compiler_params=pltpu.CompilerParams(
            dimension_semantics=("parallel", "arbitrary"),
            vmem_limit_bytes=vmem_limit_mb * 1024 * 1024,    # fits v7x 64 MiB
        ),
    )(obs_p, act_p, *weight_args)

    return q[:B, 0:1], q[:B, 1:2]


# ---------------------------- pure-JAX reference -----------------------------
def _reference_forward(obs, action, params, *, ln_eps=1e-5):
    h = obs @ params["trunk_w"] + params["trunk_b"]
    mu = jnp.mean(h, axis=-1, keepdims=True)
    var = jnp.mean((h - mu) ** 2, axis=-1, keepdims=True)
    h = (h - mu) / jnp.sqrt(var + ln_eps) * params["ln_g"] + params["ln_b"]
    h = jnp.tanh(h)
    ha = jnp.concatenate([h, action], axis=-1)

    def head(p, pre):
        z = jnp.maximum(ha @ p[f"{pre}_w1"] + p[f"{pre}_b1"], 0.0)
        z = jnp.maximum(z @ p[f"{pre}_w2"] + p[f"{pre}_b2"], 0.0)
        return z @ p[f"{pre}_w3"] + p[f"{pre}_b3"]

    return head(params, "q1"), head(params, "q2")


if __name__ == "__main__":
    # Small shapes consistent with the module: batch=8, repr_dim=128,
    # feature_dim=64, action_dim=6, hidden_dim=256.
    B, repr_dim, feature_dim, action_dim, hidden_dim = 8, 128, 64, 6, 256

    key = jax.random.PRNGKey(0)
    ks = jax.random.split(key, 16)
    n = lambda k, s, scale=0.05: scale * jax.random.normal(k, s, dtype=jnp.float32)

    params = {
        "trunk_w": n(ks[0], (repr_dim, feature_dim)),
        "trunk_b": n(ks[1], (feature_dim,)),
        "ln_g": jnp.ones((feature_dim,), jnp.float32),
        "ln_b": jnp.zeros((feature_dim,), jnp.float32),
        "q1_w1": n(ks[2], (feature_dim + action_dim, hidden_dim)),
        "q1_b1": n(ks[3], (hidden_dim,)),
        "q1_w2": n(ks[4], (hidden_dim, hidden_dim)),
        "q1_b2": n(ks[5], (hidden_dim,)),
        "q1_w3": n(ks[6], (hidden_dim, 1)),
        "q1_b3": n(ks[7], (1,)),
        "q2_w1": n(ks[8], (feature_dim + action_dim, hidden_dim)),
        "q2_b1": n(ks[9], (hidden_dim,)),
        "q2_w2": n(ks[10], (hidden_dim, hidden_dim)),
        "q2_b2": n(ks[11], (hidden_dim,)),
        "q2_w3": n(ks[12], (hidden_dim, 1)),
        "q2_b3": n(ks[13], (1,)),
    }
    obs = jax.random.normal(ks[14], (B, repr_dim), dtype=jnp.float32)
    action = jax.random.uniform(ks[15], (B, action_dim), minval=-1.0, maxval=1.0,
                                dtype=jnp.float32)

    # fp32 compute path: bit-tight against the fp32 reference.
    q1_f32, q2_f32 = critic_forward(obs, action, params,
                                    compute_dtype=jnp.float32)
    jax.block_until_ready((q1_f32, q2_f32))

    # bf16-input / f32-accumulate path (the fast production path).
    q1_bf16, q2_bf16 = critic_forward(obs, action, params,
                                      compute_dtype=jnp.bfloat16)
    jax.block_until_ready((q1_bf16, q2_bf16))

    q1_ref, q2_ref = _reference_forward(obs, action, params)

    assert q1_f32.shape == (B, 1) and q2_f32.shape == (B, 1)
    assert q1_bf16.shape == (B, 1) and q2_bf16.shape == (B, 1)
    assert jnp.allclose(q1_f32, q1_ref, atol=1e-4, rtol=1e-4)
    assert jnp.allclose(q2_f32, q2_ref, atol=1e-4, rtol=1e-4)
    # bf16 inputs -> looser tolerance (as flagged in the perf review).
    assert jnp.allclose(q1_bf16, q1_ref, atol=3e-2, rtol=3e-2)
    assert jnp.allclose(q2_bf16, q2_ref, atol=3e-2, rtol=3e-2)

    print("KERNEL_OK")
</pallas_src>

<mosaic_0001>
module attributes {stable_mosaic.version = 11 : i64} {
  func.func @_critic_kernel(%arg0: i32, %arg1: i32, %arg2: memref<8x128xf32, #tpu.memory_space<vmem>>, %arg3: memref<8x6xf32, #tpu.memory_space<vmem>>, %arg4: memref<128x64xf32, #tpu.memory_space<vmem>>, %arg5: memref<1x64xf32, #tpu.memory_space<vmem>>, %arg6: memref<1x64xf32, #tpu.memory_space<vmem>>, %arg7: memref<1x64xf32, #tpu.memory_space<vmem>>, %arg8: memref<64x512xf32, #tpu.memory_space<vmem>>, %arg9: memref<6x512xf32, #tpu.memory_space<vmem>>, %arg10: memref<1x512xf32, #tpu.memory_space<vmem>>, %arg11: memref<256x256xf32, #tpu.memory_space<vmem>>, %arg12: memref<1x256xf32, #tpu.memory_space<vmem>>, %arg13: memref<1x256xf32, #tpu.memory_space<vmem>>, %arg14: memref<1x1xf32, #tpu.memory_space<vmem>>, %arg15: memref<256x256xf32, #tpu.memory_space<vmem>>, %arg16: memref<1x256xf32, #tpu.memory_space<vmem>>, %arg17: memref<1x256xf32, #tpu.memory_space<vmem>>, %arg18: memref<1x1xf32, #tpu.memory_space<vmem>>, %arg19: memref<8x2xf32, #tpu.memory_space<vmem>>, %arg20: memref<8x64xf32, #tpu.memory_space<vmem>>) attributes {dimension_semantics = [#tpu.dimension_semantics<parallel>, #tpu.dimension_semantics<arbitrary>], iteration_bounds = array<i64: 1, 1>, scalar_prefetch = 0 : i64, scratch_operands = 1 : i64, tpu.core_type = #tpu.core_type<tc>, window_params = [{transform_indices = @transform_0, window_bounds = array<i64: 8, 128>}, {transform_indices = @transform_1, window_bounds = array<i64: 8, 6>}, {pipeline_mode = #tpu.pipeline_mode<synchronous>, transform_indices = @transform_2, window_bounds = array<i64: 128, 64>}, {pipeline_mode = #tpu.pipeline_mode<synchronous>, transform_indices = @transform_3, window_bounds = array<i64: 1, 64>}, {pipeline_mode = #tpu.pipeline_mode<synchronous>, transform_indices = @transform_4, window_bounds = array<i64: 1, 64>}, {pipeline_mode = #tpu.pipeline_mode<synchronous>, transform_indices = @transform_5, window_bounds = array<i64: 1, 64>}, {pipeline_mode = #tpu.pipeline_mode<synchronous>, transform_indices = @transform_6, window_bounds = array<i64: 64, 512>}, {pipeline_mode = #tpu.pipeline_mode<synchronous>, transform_indices = @transform_7, window_bounds = array<i64: 6, 512>}, {pipeline_mode = #tpu.pipeline_mode<synchronous>, transform_indices = @transform_8, window_bounds = array<i64: 1, 512>}, {pipeline_mode = #tpu.pipeline_mode<synchronous>, transform_indices = @transform_9, window_bounds = array<i64: 256, 256>}, {pipeline_mode = #tpu.pipeline_mode<synchronous>, transform_indices = @transform_10, window_bounds = array<i64: 1, 256>}, {pipeline_mode = #tpu.pipeline_mode<synchronous>, transform_indices = @transform_11, window_bounds = array<i64: 1, 256>}, {pipeline_mode = #tpu.pipeline_mode<synchronous>, transform_indices = @transform_12, window_bounds = array<i64: 1, 1>}, {pipeline_mode = #tpu.pipeline_mode<synchronous>, transform_indices = @transform_13, window_bounds = array<i64: 256, 256>}, {pipeline_mode = #tpu.pipeline_mode<synchronous>, transform_indices = @transform_14, window_bounds = array<i64: 1, 256>}, {pipeline_mode = #tpu.pipeline_mode<synchronous>, transform_indices = @transform_15, window_bounds = array<i64: 1, 256>}, {pipeline_mode = #tpu.pipeline_mode<synchronous>, transform_indices = @transform_16, window_bounds = array<i64: 1, 1>}, {transform_indices = @transform_17, window_bounds = array<i64: 8, 2>}]} {
    %c0_i32 = arith.constant 0 : i32
    %0 = arith.cmpi eq, %arg1, %c0_i32 : i32
    %1 = arith.extui %0 : i1 to i32
    %c0_i32_0 = arith.constant 0 : i32
    %2 = arith.cmpi ne, %1, %c0_i32_0 : i32
    scf.if %2 {
      %cst_10 = arith.constant 0.000000e+00 : f32
      %12 = vector.broadcast %cst_10 : f32 to vector<8x64xf32>
      %c0_11 = arith.constant 0 : index
      %c0_12 = arith.constant 0 : index
      %13 = vector.load %arg20[%c0_11, %c0_12] : memref<8x64xf32, #tpu.memory_space<vmem>>, vector<8x64xf32>
      tpu.vector_store %arg20[%c0_11, %c0_12], %12 {strides = array<i32>} : memref<8x64xf32, #tpu.memory_space<vmem>>, vector<8x64xf32>,
    } else {
    }
    %c0 = arith.constant 0 : index
    %c0_1 = arith.constant 0 : index
    %3 = vector.load %arg20[%c0, %c0_1] : memref<8x64xf32, #tpu.memory_space<vmem>>, vector<8x64xf32>
    %c0_2 = arith.constant 0 : index
    %c0_3 = arith.constant 0 : index
    %4 = vector.load %arg2[%c0_2, %c0_3] : memref<8x128xf32, #tpu.memory_space<vmem>>, vector<8x128xf32>
    %c0_4 = arith.constant 0 : index
    %c0_5 = arith.constant 0 : index
    %5 = vector.load %arg4[%c0_4, %c0_5] : memref<128x64xf32, #tpu.memory_space<vmem>>, vector<128x64xf32>
    %cst = arith.constant dense<0.000000e+00> : vector<8x64xf32>
    %6 = tpu.matmul %4, %5, %cst {dimension_numbers = #tpu.dot_dimension_numbers<[1], [0], [0], [1], [0, 0, 1, 1], [], []>} : vector<8x128xf32>, vector<128x64xf32>, vector<8x64xf32> -> vector<8x64xf32>
    %7 = arith.addf %3, %6 : vector<8x64xf32>
    %c0_6 = arith.constant 0 : index
    %c0_7 = arith.constant 0 : index
    %8 = vector.load %arg20[%c0_6, %c0_7] : memref<8x64xf32, #tpu.memory_space<vmem>>, vector<8x64xf32>
    tpu.vector_store %arg20[%c0_6, %c0_7], %7 {strides = array<i32>} : memref<8x64xf32, #tpu.memory_space<vmem>>, vector<8x64xf32>,
    %c0_i32_8 = arith.constant 0 : i32
    %9 = arith.cmpi eq, %arg1, %c0_i32_8 : i32
    %10 = arith.extui %9 : i1 to i32
    %c0_i32_9 = arith.constant 0 : i32
    %11 = arith.cmpi ne, %10, %c0_i32_9 : i32
    scf.if %11 {
      %c0_10 = arith.constant 0 : index
      %c0_11 = arith.constant 0 : index
      %12 = vector.load %arg20[%c0_10, %c0_11] : memref<8x64xf32, #tpu.memory_space<vmem>>, vector<8x64xf32>
      %c0_12 = arith.constant 0 : index
      %c0_13 = arith.constant 0 : index
      %13 = vector.load %arg5[%c0_12, %c0_13] : memref<1x64xf32, #tpu.memory_space<vmem>>, vector<1x64xf32>
      %14 = vector.broadcast %13 : vector<1x64xf32> to vector<8x64xf32>
      %15 = arith.addf %12, %14 : vector<8x64xf32>
      %cst_14 = arith.constant dense<0.000000e+00> : vector<8xf32>
      %16 = vector.multi_reduction <add>, %15, %cst_14 [1] : vector<8x64xf32> to vector<8xf32>
      %17 = vector.shape_cast %16 : vector<8xf32> to vector<8x1xf32>
      %cst_15 = arith.constant 6.400000e+01 : f32
      %18 = vector.broadcast %cst_15 : f32 to vector<8x1xf32>
      %19 = arith.divf %17, %18 : vector<8x1xf32>
      %20 = vector.broadcast %19 : vector<8x1xf32> to vector<8x64xf32>
      %21 = arith.subf %15, %20 : vector<8x64xf32>
      %22 = arith.mulf %21, %21 : vector<8x64xf32>
      %cst_16 = arith.constant dense<0.000000e+00> : vector<8xf32>
      %23 = vector.multi_reduction <add>, %22, %cst_16 [1] : vector<8x64xf32> to vector<8xf32>
      %24 = vector.shape_cast %23 : vector<8xf32> to vector<8x1xf32>
      %cst_17 = arith.constant 6.400000e+01 : f32
      %25 = vector.broadcast %cst_17 : f32 to vector<8x1xf32>
      %26 = arith.divf %24, %25 : vector<8x1xf32>
      %cst_18 = arith.constant 9.99999974E-6 : f32
      %27 = vector.broadcast %cst_18 : f32 to vector<8x1xf32>
      %28 = arith.addf %26, %27 : vector<8x1xf32>
      %29 = math.rsqrt %28 : vector<8x1xf32>
      %30 = vector.broadcast %29 : vector<8x1xf32> to vector<8x64xf32>
      %31 = arith.mulf %21, %30 : vector<8x64xf32>
      %c0_19 = arith.constant 0 : index
      %c0_20 = arith.constant 0 : index
      %32 = vector.load %arg6[%c0_19, %c0_20] : memref<1x64xf32, #tpu.memory_space<vmem>>, vector<1x64xf32>
      %33 = vector.broadcast %32 : vector<1x64xf32> to vector<8x64xf32>
      %34 = arith.mulf %31, %33 : vector<8x64xf32>
      %c0_21 = arith.constant 0 : index
      %c0_22 = arith.constant 0 : index
      %35 = vector.load %arg7[%c0_21, %c0_22] : memref<1x64xf32, #tpu.memory_space<vmem>>, vector<1x64xf32>
      %36 = vector.broadcast %35 : vector<1x64xf32> to vector<8x64xf32>
      %37 = arith.addf %34, %36 : vector<8x64xf32>
      %38 = math.tanh %37 : vector<8x64xf32>
      %c0_23 = arith.constant 0 : index
      %c0_24 = arith.constant 0 : index
      %39 = vector.load %arg8[%c0_23, %c0_24] : memref<64x512xf32, #tpu.memory_space<vmem>>, vector<64x512xf32>
      %cst_25 = arith.constant dense<0.000000e+00> : vector<8x512xf32>
      %40 = tpu.matmul %38, %39, %cst_25 {dimension_numbers = #tpu.dot_dimension_numbers<[1], [0], [0], [1], [0, 0, 1, 1], [], []>} : vector<8x64xf32>, vector<64x512xf32>, vector<8x512xf32> -> vector<8x512xf32>
      %c0_26 = arith.constant 0 : index
      %c0_27 = arith.constant 0 : index
      %41 = vector.load %arg3[%c0_26, %c0_27] : memref<8x6xf32, #tpu.memory_space<vmem>>, vector<8x6xf32>
      %c0_28 = arith.constant 0 : index
      %c0_29 = arith.constant 0 : index
      %42 = vector.load %arg9[%c0_28, %c0_29] : memref<6x512xf32, #tpu.memory_space<vmem>>, vector<6x512xf32>
      %cst_30 = arith.constant dense<0.000000e+00> : vector<8x512xf32>
      %43 = tpu.matmul %41, %42, %cst_30 {dimension_numbers = #tpu.dot_dimension_numbers<[1], [0], [0], [1], [0, 0, 1, 1], [], []>} : vector<8x6xf32>, vector<6x512xf32>, vector<8x512xf32> -> vector<8x512xf32>
      %44 = arith.addf %40, %43 : vector<8x512xf32>
      %c0_31 = arith.constant 0 : index
      %c0_32 = arith.constant 0 : index
      %45 = vector.load %arg10[%c0_31, %c0_32] : memref<1x512xf32, #tpu.memory_space<vmem>>, vector<1x512xf32>
      %46 = vector.broadcast %45 : vector<1x512xf32> to vector<8x512xf32>
      %47 = arith.addf %44, %46 : vector<8x512xf32>
      %cst_33 = arith.constant 0.000000e+00 : f32
      %48 = vector.broadcast %cst_33 : f32 to vector<8x512xf32>
      %49 = arith.maximumf %47, %48 : vector<8x512xf32>
      %50 = vector.extract_strided_slice %49 {offsets = [0, 0], sizes = [8, 256], strides = [1, 1]} : vector<8x512xf32> to vector<8x256xf32>
      %c0_34 = arith.constant 0 : index
      %c0_35 = arith.constant 0 : index
      %51 = vector.load %arg11[%c0_34, %c0_35] : memref<256x256xf32, #tpu.memory_space<vmem>>, vector<256x256xf32>
      %cst_36 = arith.constant dense<0.000000e+00> : vector<8x256xf32>
      %52 = tpu.matmul %50, %51, %cst_36 {dimension_numbers = #tpu.dot_dimension_numbers<[1], [0], [0], [1], [0, 0, 1, 1], [], []>} : vector<8x256xf32>, vector<256x256xf32>, vector<8x256xf32> -> vector<8x256xf32>
      %c0_37 = arith.constant 0 : index
      %c0_38 = arith.constant 0 : index
      %53 = vector.load %arg12[%c0_37, %c0_38] : memref<1x256xf32, #tpu.memory_space<vmem>>, vector<1x256xf32>
      %54 = vector.broadcast %53 : vector<1x256xf32> to vector<8x256xf32>
      %55 = arith.addf %52, %54 : vector<8x256xf32>
      %cst_39 = arith.constant 0.000000e+00 : f32
      %56 = vector.broadcast %cst_39 : f32 to vector<8x256xf32>
      %57 = arith.maximumf %55, %56 : vector<8x256xf32>
      %c0_40 = arith.constant 0 : index
      %c0_41 = arith.constant 0 : index
      %58 = vector.load %arg13[%c0_40, %c0_41] : memref<1x256xf32, #tpu.memory_space<vmem>>, vector<1x256xf32>
      %59 = vector.broadcast %58 : vector<1x256xf32> to vector<8x256xf32>
      %60 = arith.mulf %57, %59 : vector<8x256xf32>
      %cst_42 = arith.constant dense<0.000000e+00> : vector<8xf32>
      %61 = vector.multi_reduction <add>, %60, %cst_42 [1] : vector<8x256xf32> to vector<8xf32>
      %62 = vector.shape_cast %61 : vector<8xf32> to vector<8x1xf32>
      %c0_43 = arith.constant 0 : index
      %c0_44 = arith.constant 0 : index
      %63 = vector.load %arg14[%c0_43, %c0_44] : memref<1x1xf32, #tpu.memory_space<vmem>>, vector<1x1xf32>
      %64 = vector.broadcast %63 : vector<1x1xf32> to vector<8x1xf32>
      %65 = arith.addf %62, %64 : vector<8x1xf32>
      %66 = vector.extract_strided_slice %49 {offsets = [0, 256], sizes = [8, 256], strides = [1, 1]} : vector<8x512xf32> to vector<8x256xf32>
      %c0_45 = arith.constant 0 : index
      %c0_46 = arith.constant 0 : index
      %67 = vector.load %arg15[%c0_45, %c0_46] : memref<256x256xf32, #tpu.memory_space<vmem>>, vector<256x256xf32>
      %cst_47 = arith.constant dense<0.000000e+00> : vector<8x256xf32>
      %68 = tpu.matmul %66, %67, %cst_47 {dimension_numbers = #tpu.dot_dimension_numbers<[1], [0], [0], [1], [0, 0, 1, 1], [], []>} : vector<8x256xf32>, vector<256x256xf32>, vector<8x256xf32> -> vector<8x256xf32>
      %c0_48 = arith.constant 0 : index
      %c0_49 = arith.constant 0 : index
      %69 = vector.load %arg16[%c0_48, %c0_49] : memref<1x256xf32, #tpu.memory_space<vmem>>, vector<1x256xf32>
      %70 = vector.broadcast %69 : vector<1x256xf32> to vector<8x256xf32>
      %71 = arith.addf %68, %70 : vector<8x256xf32>
      %cst_50 = arith.constant 0.000000e+00 : f32
      %72 = vector.broadcast %cst_50 : f32 to vector<8x256xf32>
      %73 = arith.maximumf %71, %72 : vector<8x256xf32>
      %c0_51 = arith.constant 0 : index
      %c0_52 = arith.constant 0 : index
      %74 = vector.load %arg17[%c0_51, %c0_52] : memref<1x256xf32, #tpu.memory_space<vmem>>, vector<1x256xf32>
      %75 = vector.broadcast %74 : vector<1x256xf32> to vector<8x256xf32>
      %76 = arith.mulf %73, %75 : vector<8x256xf32>
      %cst_53 = arith.constant dense<0.000000e+00> : vector<8xf32>
      %77 = vector.multi_reduction <add>, %76, %cst_53 [1] : vector<8x256xf32> to vector<8xf32>
      %78 = vector.shape_cast %77 : vector<8xf32> to vector<8x1xf32>
      %c0_54 = arith.constant 0 : index
      %c0_55 = arith.constant 0 : index
      %79 = vector.load %arg18[%c0_54, %c0_55] : memref<1x1xf32, #tpu.memory_space<vmem>>, vector<1x1xf32>
      %80 = vector.broadcast %79 : vector<1x1xf32> to vector<8x1xf32>
      %81 = arith.addf %78, %80 : vector<8x1xf32>
      %82 = tpu.concatenate %65, %81 in 1 : vector<8x1xf32>, vector<8x1xf32> -> vector<8x2xf32>
      %c0_56 = arith.constant 0 : index
      %c0_57 = arith.constant 0 : index
      %83 = vector.load %arg19[%c0_56, %c0_57] : memref<8x2xf32, #tpu.memory_space<vmem>>, vector<8x2xf32>
      tpu.vector_store %arg19[%c0_56, %c0_57], %82 {strides = array<i32>} : memref<8x2xf32, #tpu.memory_space<vmem>>, vector<8x2xf32>,
    } else {
    }
    return
  }
  func.func @transform_0(%arg0: i32, %arg1: i32) -> (i32, i32) {
    %c0_i32 = arith.constant 0 : i32
    return %arg0, %arg1 : i32, i32
  }
  func.func @transform_1(%arg0: i32, %arg1: i32) -> (i32, i32) {
    %c0_i32 = arith.constant 0 : i32
    %c0_i32_0 = arith.constant 0 : i32
    return %arg0, %c0_i32 : i32, i32
  }
  func.func @transform_2(%arg0: i32, %arg1: i32) -> (i32, i32) {
    %c0_i32 = arith.constant 0 : i32
    %c0_i32_0 = arith.constant 0 : i32
    %c0_i32_1 = arith.constant 0 : i32
    return %c0_i32, %c0_i32_0 : i32, i32
  }
  func.func @transform_3(%arg0: i32, %arg1: i32) -> (i32, i32) {
    %c0_i32 = arith.constant 0 : i32
    %c0_i32_0 = arith.constant 0 : i32
    %c0_i32_1 = arith.constant 0 : i32
    return %c0_i32, %c0_i32_0 : i32, i32
  }
  func.func @transform_4(%arg0: i32, %arg1: i32) -> (i32, i32) {
    %c0_i32 = arith.constant 0 : i32
    %c0_i32_0 = arith.constant 0 : i32
    %c0_i32_1 = arith.constant 0 : i32
    return %c0_i32, %c0_i32_0 : i32, i32
  }
  func.func @transform_5(%arg0: i32, %arg1: i32) -> (i32, i32) {
    %c0_i32 = arith.constant 0 : i32
    %c0_i32_0 = arith.constant 0 : i32
    %c0_i32_1 = arith.constant 0 : i32
    return %c0_i32, %c0_i32_0 : i32, i32
  }
  func.func @transform_6(%arg0: i32, %arg1: i32) -> (i32, i32) {
    %c0_i32 = arith.constant 0 : i32
    %c0_i32_0 = arith.constant 0 : i32
    %c0_i32_1 = arith.constant 0 : i32
    return %c0_i32, %c0_i32_0 : i32, i32
  }
  func.func @transform_7(%arg0: i32, %arg1: i32) -> (i32, i32) {
    %c0_i32 = arith.constant 0 : i32
    %c0_i32_0 = arith.constant 0 : i32
    %c0_i32_1 = arith.constant 0 : i32
    return %c0_i32, %c0_i32_0 : i32, i32
  }
  func.func @transform_8(%arg0: i32, %arg1: i32) -> (i32, i32) {
    %c0_i32 = arith.constant 0 : i32
    %c0_i32_0 = arith.constant 0 : i32
    %c0_i32_1 = arith.constant 0 : i32
    return %c0_i32, %c0_i32_0 : i32, i32
  }
  func.func @transform_9(%arg0: i32, %arg1: i32) -> (i32, i32) {
    %c0_i32 = arith.constant 0 : i32
    %c0_i32_0 = arith.constant 0 : i32
    %c0_i32_1 = arith.constant 0 : i32
    return %c0_i32, %c0_i32_0 : i32, i32
  }
  func.func @transform_10(%arg0: i32, %arg1: i32) -> (i32, i32) {
    %c0_i32 = arith.constant 0 : i32
    %c0_i32_0 = arith.constant 0 : i32
    %c0_i32_1 = arith.constant 0 : i32
    return %c0_i32, %c0_i32_0 : i32, i32
  }
  func.func @transform_11(%arg0: i32, %arg1: i32) -> (i32, i32) {
    %c0_i32 = arith.constant 0 : i32
    %c0_i32_0 = arith.constant 0 : i32
    %c0_i32_1 = arith.constant 0 : i32
    return %c0_i32, %c0_i32_0 : i32, i32
  }
  func.func @transform_12(%arg0: i32, %arg1: i32) -> (i32, i32) {
    %c0_i32 = arith.constant 0 : i32
    %c0_i32_0 = arith.constant 0 : i32
    %c0_i32_1 = arith.constant 0 : i32
    return %c0_i32, %c0_i32_0 : i32, i32
  }
  func.func @transform_13(%arg0: i32, %arg1: i32) -> (i32, i32) {
    %c0_i32 = arith.constant 0 : i32
    %c0_i32_0 = arith.constant 0 : i32
    %c0_i32_1 = arith.constant 0 : i32
    return %c0_i32, %c0_i32_0 : i32, i32
  }
  func.func @transform_14(%arg0: i32, %arg1: i32) -> (i32, i32) {
    %c0_i32 = arith.constant 0 : i32
    %c0_i32_0 = arith.constant 0 : i32
    %c0_i32_1 = arith.constant 0 : i32
    return %c0_i32, %c0_i32_0 : i32, i32
  }
  func.func @transform_15(%arg0: i32, %arg1: i32) -> (i32, i32) {
    %c0_i32 = arith.constant 0 : i32
    %c0_i32_0 = arith.constant 0 : i32
    %c0_i32_1 = arith.constant 0 : i32
    return %c0_i32, %c0_i32_0 : i32, i32
  }
  func.func @transform_16(%arg0: i32, %arg1: i32) -> (i32, i32) {
    %c0_i32 = arith.constant 0 : i32
    %c0_i32_0 = arith.constant 0 : i32
    %c0_i32_1 = arith.constant 0 : i32
    return %c0_i32, %c0_i32_0 : i32, i32
  }
  func.func @transform_17(%arg0: i32, %arg1: i32) -> (i32, i32) {
    %c0_i32 = arith.constant 0 : i32
    %c0_i32_0 = arith.constant 0 : i32
    return %arg0, %c0_i32 : i32, i32
  }
}

</mosaic_0001>

<bundles_post_ra>
// kernel: tpu_custom_call.1
= control target key start
LH: loop header
LB: loop body
LE: loop exit
PB: predicated region body
PF: predicated region fallthrough
CT: control target
= control target key end

     0   :  { %s1580_s0 = inlined_call_operand.vmem [shape: f32[8,128], index: 0, kind: input, shape index: {}]   ;;  %s1581_s1 = inlined_call_operand.vmem [shape: f32[8,6], index: 1, kind: input, shape index: {}]   ;;  %s1582_s2 = inlined_call_operand.vmem [shape: f32[128,64], index: 2, kind: input, shape index: {}]   ;;  %s1583_s3 = inlined_call_operand.vmem [shape: f32[1,64], index: 3, kind: input, shape index: {}]   ;;  %s1584_s4 = inlined_call_operand.vmem [shape: f32[1,64], index: 4, kind: input, shape index: {}]   ;;  %s1585_s5 = inlined_call_operand.vmem [shape: f32[1,64], index: 5, kind: input, shape index: {}]   ;;  %s1586_s6 = inlined_call_operand.hbm [shape: f32[64,512], index: 6, kind: input, shape index: {}]   ;;  %s1587_s7 = inlined_call_operand.vmem [shape: f32[6,512], index: 7, kind: input, shape index: {}]   ;;  %s1588_s8 = inlined_call_operand.vmem [shape: f32[1,512], index: 8, kind: input, shape index: {}]   ;;  %s1589_s9 = inlined_call_operand.hbm [shape: f32[256,256], index: 9, kind: input, shape index: {}]   ;;  %s1590_s10 = inlined_call_operand.vmem [shape: f32[1,256], index: 10, kind: input, shape index: {}]   ;;  %s1591_s11 = inlined_call_operand.vmem [shape: f32[1,256], index: 11, kind: input, shape index: {}]   ;;  %s1592_s12 = inlined_call_operand.<no memory space> [shape: f32[1,1], index: 12, kind: input, shape index: {}]   ;;  %s1593_s13 = inlined_call_operand.hbm [shape: f32[256,256], index: 13, kind: input, shape index: {}]   ;;  %s1594_s14 = inlined_call_operand.vmem [shape: f32[1,256], index: 14, kind: input, shape index: {}]   ;;  %s1595_s15 = inlined_call_operand.vmem [shape: f32[1,256], index: 15, kind: input, shape index: {}]   ;;  %s1596_s17 = inlined_call_operand.vmem [shape: f32[8,2], index: 17, kind: output, shape index: {}]   ;;  %s1597_s16 = inlined_call_operand.<no memory space> [shape: f32[1,1], index: 16, kind: input, shape index: {}]  }
   0x1   :  { %1598 = sst [smem:[#allocation12_spill]] %s1580_s0  ;;  %v22_v0 = vstv %s1592_s12  ;;  %v24_v1 = vstv %s1597_s16 }
   0x2   :  { %1599 = sst [smem:[#allocation13_spill]] %s1581_s1  ;;  %23 = vst [vmem:[#allocation3] sm:$0x1] %v22_v0  ;;  %25 = vst [vmem:[#allocation4] sm:$0x1] %v24_v1 }
   0x3   :  { %26 = vsyncpa [#allocation6], 0 }
   0x4   :  { %27 = vsyncpa [#allocation8], 0  ;;  %s1312_s28 = smov [#allocation7]   ;;  %s1242_s18 = scalar_lea.hbm %s1589_s9, 8192 }
   0x5   :  { %s61_s29 = sshll.u32 %s1312_s28, 4  ;;  %p1243_p0 = scmp.ne.s32.totalorder %s1589_s9, %s1242_s18  ;;  %s62_s29 = int_to_ptr.vmem [resolvable:$true] %s61_s29 }
   0x6   :  { %p1246_p1 = scmp.lt.u32.totalorder %s1242_s18, %s1589_s9 }
   0x8   :  { %p1248_p2 = pnand %p1246_p1, %p1243_p0 }
   0xa   :  { %1251 = shalt.err (!%p1248_p2)
}
   0xb   :  { %s1252_s16 = scalar_lea.vmem %s62_s29, 8192  ;;  %p1257_p4 = scmp.lt.s32.totalorder %s62_s29, %s62_s29 }
   0xc   :  { %p1253_p3 = scmp.ne.s32.totalorder %s62_s29, %s1252_s16  ;;  %p1258_p5 = scmp.lt.s32.totalorder %s1252_s16, %s1252_s16 }
   0xe   :  { %p1259_p6 = por %p1258_p5, %p1257_p4 }
  0x10   :  { %p1260_p7 = pnand %p1259_p6, %p1253_p3 }
  0x12   :  { %1263 = shalt.err (!%p1260_p7)
}
  0x13   :  { %s1313_s21 = smov 256   ;;  %s1314_s22 = smov 16  }
  0x14   :  { %67 = dma.hbm_to_vmem [thread:$0]  %s1589_s9, 8192, %s62_s29, [#allocation8], %s1313_s21, %s1313_s21, %s1314_s22  }
  0x15   :  { %s1315_s25 = smov [#allocation5]   ;;  %s1264_s0 = scalar_lea.hbm %s1586_s6, 4096 }
  0x16   :  { %s45_s26 = sshll.u32 %s1315_s25, 4  ;;  %p1265_p8 = scmp.ne.s32.totalorder %s1586_s6, %s1264_s0  ;;  %s46_s26 = int_to_ptr.vmem [resolvable:$true] %s45_s26 }
  0x17   :  { %p1268_p9 = scmp.lt.u32.totalorder %s1264_s0, %s1586_s6 }
  0x19   :  { %p1270_p10 = pnand %p1268_p9, %p1265_p8 }
  0x1b   :  { %1273 = shalt.err (!%p1270_p10)
}
  0x1c   :  { %s1274_s12 = scalar_lea.vmem %s46_s26, 4096  ;;  %p1279_p12 = scmp.lt.s32.totalorder %s46_s26, %s46_s26 }
  0x1d   :  { %p1275_p11 = scmp.ne.s32.totalorder %s46_s26, %s1274_s12  ;;  %p1280_p13 = scmp.lt.s32.totalorder %s1274_s12, %s1274_s12 }
  0x1f   :  { %p1281_p0 = por %p1280_p13, %p1279_p12 }
  0x21   :  { %p1282_p1 = pnand %p1281_p0, %p1275_p11 }
  0x23   :  { %1285 = shalt.err (!%p1282_p1)
}
  0x24   :  { %s1316_s9 = smov 512   ;;  %s1317_s29 = smov 32  }
  0x25   :  { %51 = dma.hbm_to_vmem [thread:$0]  %s1586_s6, 4096, %s46_s26, [#allocation6], %s1316_s9, %s1316_s9, %s1317_s29  }
  0x26   :  { %s1318_s23 = smov [#allocation9]   ;;  %s1286_s28 = scalar_lea.hbm %s1593_s13, 8192 }
  0x27   :  { %s79_s24 = sshll.u32 %s1318_s23, 4  ;;  %p1287_p2 = scmp.ne.s32.totalorder %s1593_s13, %s1286_s28  ;;  %s80_s24 = int_to_ptr.vmem [resolvable:$true] %s79_s24 }
  0x28   :  { %p1290_p3 = scmp.lt.u32.totalorder %s1286_s28, %s1593_s13 }
  0x2a   :  { %p1292_p4 = pnand %p1290_p3, %p1287_p2 }
  0x2c   :  { %1295 = shalt.err (!%p1292_p4)
}
  0x2d   :  { %s1296_s1 = scalar_lea.vmem %s80_s24, 8192  ;;  %p1301_p6 = scmp.lt.s32.totalorder %s80_s24, %s80_s24 }
  0x2e   :  { %p1297_p5 = scmp.ne.s32.totalorder %s80_s24, %s1296_s1  ;;  %p1302_p7 = scmp.lt.s32.totalorder %s1296_s1, %s1296_s1 }
  0x30   :  { %p1303_p8 = por %p1302_p7, %p1301_p6 }
  0x32   :  { %p1304_p9 = pnand %p1303_p8, %p1297_p5 }
  0x34   :  { %1307 = shalt.err (!%p1304_p9)
}
  0x35   :  { %85 = dma.hbm_to_vmem [thread:$0]  %s1593_s13, 8192, %s80_s24, [#allocation8], %s1313_s21, %s1313_s21, %s1314_s22  }
  0x36   :  { %1308 = dma.done.wait [#allocation6], 4096  }
  0x37   :  { %1309 = vsyncadd [#allocation6], 4294963200 }
  0x38   :  { %1310 = dma.done.wait [#allocation8], 16384  }
  0x39   :  { %1311 = vsyncadd [#allocation8], 4294950912  ;;  %vm105_vm0 = vcmask 523264   ;;  %v1319_v2 = vmov 0.0|0.0   ;;  %vm1320_vm1 = vmmov 0   ;;  %v1321_v3 = vmov 0.0  }
  0x3a   :  { %1039 = vmatprep.subr.bf16.mxu0 %v1319_v2  ;;  %1036 = vmatprep.mubr.msk.f32.mxu0 %vm1320_vm1, %v1321_v3  ;;  %106 = vst.msk [vmem:[#allocation2] sm:$0xff] %vm105_vm0, %v1321_v3  ;;  %v109_v4 = vld [vmem:[%s1582_s2] sm:$0xff]  ;;  %v110_v5 = vld [vmem:[%s1582_s2 + $0x8] sm:$0xff]  ;;  %v111_v6 = vld [vmem:[%s1582_s2 + $0x10] sm:$0xff]  ;;  %s1600_s30 = sld [smem:[#allocation12_spill]]  ;;  %vm282_vm2 = vcmask 1045504  }
  0x3b   :  { %430 = vmatprep.mubr.f32.mxu1 %v1321_v3  ;;  %v1040_v7 = vpack.c.bf16 %v110_v5, %v109_v4  ;;  %v112_v8 = vld [vmem:[%s1582_s2 + $0x18] sm:$0xff]  ;;  %v113_v10 = vld [vmem:[%s1582_s2 + $0x20] sm:$0xff]  ;;  %v114_v11 = vld [vmem:[%s1582_s2 + $0x28] sm:$0xff]  ;;  %s1601_s9 = sld [smem:[#allocation13_spill]]  ;;  %vm278_vm3 = vcmask 48128   ;;  %vm964_vm4 = vcmask 7168  }
  0x3c   :  { %v1043_v9 = vpack.c.bf16 %v112_v8, %v111_v6  ;;  %v1046_v12 = vpack.c.bf16 %v114_v11, %v113_v10  ;;  %v115_v13 = vld [vmem:[%s1582_s2 + $0x30] sm:$0xff]  ;;  %v116_v14 = vld [vmem:[%s1582_s2 + $0x38] sm:$0xff]  ;;  %v117_v16 = vld [vmem:[%s1582_s2 + $0x40] sm:$0xff]  ;;  %vm966_vm5 = vcmask 15360  }
  0x3d   :  { %1041 = vmatpush3.bf16.msra.mxu0 %v1040_v7  ;;  %v1049_v15 = vpack.c.bf16 %v116_v14, %v115_v13  ;;  %v118_v17 = vld [vmem:[%s1582_s2 + $0x48] sm:$0xff]  ;;  %v119_v19 = vld [vmem:[%s1582_s2 + $0x50] sm:$0xff]  ;;  %v120_v20 = vld [vmem:[%s1582_s2 + $0x58] sm:$0xff] }
  0x3e   :  { %1042 = vmatprep.subr.bf16.mxu0 %v1319_v2  ;;  %v1052_v18 = vpack.c.bf16 %v118_v17, %v117_v16  ;;  %v1055_v21 = vpack.c.bf16 %v120_v20, %v119_v19  ;;  %v121_v22 = vld [vmem:[%s1582_s2 + $0x60] sm:$0xff]  ;;  %v122_v23 = vld [vmem:[%s1582_s2 + $0x68] sm:$0xff]  ;;  %v123_v25 = vld [vmem:[%s1582_s2 + $0x70] sm:$0xff] }
  0x3f   :  { %v1058_v24 = vpack.c.bf16 %v122_v23, %v121_v22  ;;  %v124_v26 = vld [vmem:[%s1582_s2 + $0x78] sm:$0xff]  ;;  %v974_v33 = vld [vmem:[%s1583_s3] ss:$0 sm:$0xff]  ;;  %v276_v45 = vld [vmem:[%s1587_s7 + $0x10] sm:$0x3f] }
  0x40   :  { %v1061_v27 = vpack.c.bf16 %v124_v26, %v123_v25  ;;  %v108_v28 = vld [vmem:[%s1600_s30] sm:$0xff]  ;;  %v277_v42 = vld [vmem:[%s1587_s7 + $0x18] sm:$0x3f]  ;;  %v241_v47 = vld [vmem:[#allocation5] sm:$0xff] }
  0x41   :  { %1044 = vmatpush3.bf16.msra.mxu0 %v1043_v9  ;;  %v107_v29 = vld [vmem:[#allocation2] sm:$0xff]  ;;  %v242_v43 = vld [vmem:[#allocation5 + $0x8] sm:$0xff]  ;;  %980 = vmatprep.subr.msk.mxu1 %vm282_vm2, %v277_v42  ;;  %v245_v48 = vld [vmem:[#allocation5 + $0x20] sm:$0xff] }
  0x42   :  { %1045 = vmatprep.subr.bf16.mxu0 %v1319_v2  ;;  %v246_v44 = vld [vmem:[#allocation5 + $0x28] sm:$0xff]  ;;  %981 = vmatpush1.msk.msra.mxu1 %vm282_vm2, %v276_v45  ;;  %v1065_v49 = vpack.c.bf16 %v245_v48, %v241_v47  ;;  %v273_v50 = vld [vmem:[%s1601_s9] sm:$0xff]  ;;  %v249_v54 = vld [vmem:[#allocation5 + $0x40] sm:$0xff] }
  0x43   :  { %v1063_v46 = vpack.c.bf16 %v246_v44, %v242_v43  ;;  %982 = vmatmul.mubr.msk.f32.vlgmr.msra.gmra.mrb[0].mxu1 %vm278_vm3, %v273_v50  ;;  %v250_v51 = vld [vmem:[#allocation5 + $0x48] sm:$0xff]  ;;  %v253_v55 = vld [vmem:[#allocation5 + $0x60] sm:$0xff]  ;;  %v274_v6 = vld [vmem:[%s1587_s7] sm:$0x3f] }
  0x44   :  { %v254_v52 = vld [vmem:[#allocation5 + $0x68] sm:$0xff]  ;;  %504 = vmatprep.mubr.f32.mxu1 %v1321_v3  ;;  %v1069_v56 = vpack.c.bf16 %v253_v55, %v249_v54  ;;  %v257_v60 = vld [vmem:[#allocation5 + $0x80] sm:$0xff]  ;;  %v244_v7 = vld [vmem:[#allocation5 + $0x18] sm:$0xff] }
  0x45   :  { %1047 = vmatpush3.bf16.msra.mxu0 %v1046_v12  ;;  %1064 = vmatprep.subr.bf16.mxu1 %v1063_v46  ;;  %v1067_v53 = vpack.c.bf16 %v254_v52, %v250_v51  ;;  %v258_v57 = vld [vmem:[#allocation5 + $0x88] sm:$0xff]  ;;  %v261_v61 = vld [vmem:[#allocation5 + $0xa0] sm:$0xff]  ;;  %v248_v8 = vld [vmem:[#allocation5 + $0x38] sm:$0xff] }
  0x46   :  { %1048 = vmatprep.subr.bf16.mxu0 %v1319_v2  ;;  %1066 = vmatpush1.bf16.msra.mxu1 %v1065_v49  ;;  %v262_v58 = vld [vmem:[#allocation5 + $0xa8] sm:$0xff]  ;;  %v1073_v63 = vpack.c.bf16 %v261_v61, %v257_v60  ;;  %v265_v1 = vld [vmem:[#allocation5 + $0xc0] sm:$0xff]  ;;  %v1079_v10 = vpack.c.bf16 %v248_v8, %v244_v7  ;;  %v615_v12 = vld [vmem:[#allocation7 + $0x18] sm:$0xff] }
  0x47   :  { %1068 = vmatprep.subr.bf16.mxu1 %v1067_v53  ;;  %v1071_v59 = vpack.c.bf16 %v262_v58, %v258_v57  ;;  %v266_v62 = vld [vmem:[#allocation5 + $0xc8] sm:$0xff]  ;;  %v275_v5 = vld [vmem:[%s1587_s7 + $0x8] sm:$0x3f]  ;;  %v634_v46 = vld [vmem:[#allocation7 + $0xb0] sm:$0xff] }
  0x48   :  { %v270_v0 = vld [vmem:[#allocation5 + $0xe8] sm:$0xff]  ;;  %v612_v13 = vld [vmem:[#allocation7] sm:$0xff]  ;;  %v619_v17 = vld [vmem:[#allocation7 + $0x38] sm:$0xff] }
  0x49   :  { %1050 = vmatpush3.bf16.msra.mxu0 %v1049_v15  ;;  %v1075_v4 = vpack.c.bf16 %v270_v0, %v266_v62  ;;  %v613_v11 = vld [vmem:[#allocation7 + $0x8] sm:$0xff]  ;;  %v614_v15 = vld [vmem:[#allocation7 + $0x10] sm:$0xff]  ;;  %v616_v20 = vld [vmem:[#allocation7 + $0x20] sm:$0xff] }
  0x4a   :  { %1051 = vmatprep.subr.bf16.mxu0 %v1319_v2  ;;  %1070 = vmatpush1.bf16.msra.mxu1 %v1069_v56  ;;  %v1095_v14 = vpack.c.bf16 %v615_v12, %v613_v11  ;;  %v617_v16 = vld [vmem:[#allocation7 + $0x28] sm:$0xff]  ;;  %v623_v23 = vld [vmem:[#allocation7 + $0x58] sm:$0xff]  ;;  %v620_v26 = vld [vmem:[#allocation7 + $0x40] sm:$0xff] }
  0x4b   :  { %1072 = vmatprep.subr.bf16.mxu1 %v1071_v59  ;;  %v1099_v19 = vpack.c.bf16 %v619_v17, %v617_v16  ;;  %v621_v22 = vld [vmem:[#allocation7 + $0x48] sm:$0xff]  ;;  %v635_v42 = vld [vmem:[#allocation7 + $0xb8] sm:$0xff]  ;;  %v632_v45 = vld [vmem:[#allocation7 + $0xa0] sm:$0xff] }
  0x4c   :  { %v1103_v25 = vpack.c.bf16 %v623_v23, %v621_v22  ;;  %v637_v47 = vld [vmem:[#allocation7 + $0xc8] sm:$0xff]  ;;  %v639_v48 = vld [vmem:[#allocation7 + $0xd8] sm:$0xff]  ;;  %v1117_v49 = vpack.c.bf16 %v634_v46, %v632_v45  ;;  %v636_v51 = vld [vmem:[#allocation7 + $0xc0] sm:$0xff] }
  0x4d   :  { %1053 = vmatpush3.bf16.msra.mxu0 %v1052_v18  ;;  %v1097_v18 = vpack.c.bf16 %v614_v15, %v612_v13  ;;  %v638_v52 = vld [vmem:[#allocation7 + $0xd0] sm:$0xff]  ;;  %v641_v53 = vld [vmem:[#allocation7 + $0xe8] sm:$0xff]  ;;  %v643_v54 = vld [vmem:[#allocation7 + $0xf8] sm:$0xff] }
  0x4e   :  { %1054 = vmatprep.subr.bf16.mxu0 %v1319_v2  ;;  %1074 = vmatpush1.bf16.msra.mxu1 %v1073_v63  ;;  %v1121_v55 = vpack.c.bf16 %v638_v52, %v636_v51  ;;  %v1123_v56 = vpack.c.bf16 %v643_v54, %v641_v53  ;;  %v640_v57 = vld [vmem:[#allocation7 + $0xe0] sm:$0xff]  ;;  %v642_v58 = vld [vmem:[#allocation7 + $0xf0] sm:$0xff]  ;;  %v645_v59 = vld [vmem:[#allocation7 + $0x108] sm:$0xff] }
  0x4f   :  { %1076 = vmatprep.subr.bf16.mxu1 %v1075_v4  ;;  %v647_v60 = vld [vmem:[#allocation7 + $0x118] sm:$0xff]  ;;  %v1125_v61 = vpack.c.bf16 %v642_v58, %v640_v57  ;;  %v644_v63 = vld [vmem:[#allocation7 + $0x100] sm:$0xff]  ;;  %v646_v0 = vld [vmem:[#allocation7 + $0x110] sm:$0xff] }
  0x50   :  { %v1127_v62 = vpack.c.bf16 %v647_v60, %v645_v59  ;;  %v1129_v4 = vpack.c.bf16 %v646_v0, %v644_v63  ;;  %v650_v7 = vld [vmem:[#allocation7 + $0x130] sm:$0xff]  ;;  %v653_v8 = vld [vmem:[#allocation7 + $0x148] sm:$0xff]  ;;  %v652_v12 = vld [vmem:[#allocation7 + $0x140] sm:$0xff] }
  0x51   :  { %1056 = vmatpush3.bf16.msra.mxu0 %v1055_v21  ;;  %v618_v21 = vld [vmem:[#allocation7 + $0x30] sm:$0xff]  ;;  %v659_v15 = vld [vmem:[#allocation7 + $0x178] sm:$0xff]  ;;  %v787_v63 = vld [vmem:[#allocation9 + $0x8] sm:$0xff] }
  0x52   :  { %1057 = vmatprep.subr.bf16.mxu0 %v1319_v2  ;;  %v654_v13 = vld [vmem:[#allocation7 + $0x150] sm:$0xff]  ;;  %v252_v45 = vld [vmem:[#allocation5 + $0x58] sm:$0xff] }
  0x53   :  { %v1137_v16 = vpack.c.bf16 %v654_v13, %v652_v12  ;;  %v256_v46 = vld [vmem:[#allocation5 + $0x78] sm:$0xff] }
  0x54   :  { %v260_v52 = vld [vmem:[#allocation5 + $0x98] sm:$0xff] }
  0x55   :  { %1059 = vmatpush3.bf16.msra.mxu0 %v1058_v24  ;;  %v1101_v24 = vpack.c.bf16 %v618_v21, %v616_v20  ;;  %v661_v20 = vld [vmem:[#allocation7 + $0x188] sm:$0xff]  ;;  %v663_v21 = vld [vmem:[#allocation7 + $0x198] sm:$0xff] }
  0x56   :  { %1060 = vmatprep.subr.bf16.mxu0 %v1319_v2  ;;  %v269_v2 = vld [vmem:[#allocation5 + $0xe0] sm:$0xff]  ;;  %v1143_v23 = vpack.c.bf16 %v663_v21, %v661_v20  ;;  %v264_v53 = vld [vmem:[#allocation5 + $0xb8] sm:$0xff] }
  0x57   :  { %v1077_v9 = vpack.c.bf16 %v269_v2, %v265_v1  ;;  %v649_v1 = vld [vmem:[#allocation7 + $0x128] sm:$0xff]  ;;  %v651_v2 = vld [vmem:[#allocation7 + $0x138] sm:$0xff]  ;;  %v1087_v54 = vpack.c.bf16 %v264_v53, %v260_v52  ;;  %v798_v21 = vld [vmem:[#allocation9 + $0x60] sm:$0xff] }
  0x58   :  { %v268_v57 = vld [vmem:[#allocation5 + $0xd8] sm:$0xff]  ;;  %v818_v52 = vld [vmem:[#allocation9 + $0x100] sm:$0xff]  ;;  %v820_v53 = vld [vmem:[#allocation9 + $0x110] sm:$0xff] }
  0x59   :  { %1062 = vmatpush3.bf16.msra.mxu0 %v1061_v27  ;;  %1078 = vmatpush1.bf16.msra.mxu1 %v1077_v9  ;;  %v622_v27 = vld [vmem:[#allocation7 + $0x50] sm:$0xff]  ;;  %v655_v9 = vld [vmem:[#allocation7 + $0x158] sm:$0xff] }
  0x5a   :  { %977 = vmatprep.subr.msk.mxu0 %vm282_vm2, %v275_v5  ;;  %1080 = vmatprep.subr.bf16.mxu1 %v1079_v10  ;;  %v1131_v5 = vpack.c.bf16 %v651_v2, %v649_v1  ;;  %v1135_v11 = vpack.c.bf16 %v655_v9, %v653_v8  ;;  %v272_v58 = vld [vmem:[#allocation5 + $0xf8] sm:$0xff]  ;;  %v790_v9 = vld [vmem:[#allocation9 + $0x20] sm:$0xff] }
  0x5b   :  { %v1091_v60 = vpack.c.bf16 %v272_v58, %v268_v57  ;;  %v789_v0 = vld [vmem:[#allocation9 + $0x18] sm:$0xff]  ;;  %v822_v57 = vld [vmem:[#allocation9 + $0x120] sm:$0xff]  ;;  %v824_v58 = vld [vmem:[#allocation9 + $0x130] sm:$0xff] }
  0x5c   :  { %1037 = vmatmul.mubr.f32.vlgmr.msra.gmra.mrb[0].mxu0 %v108_v28  ;;  %v625_v28 = vld [vmem:[#allocation7 + $0x68] sm:$0xff]  ;;  %v1159_v2 = vpack.c.bf16 %v789_v0, %v787_v63  ;;  %v797_v12 = vld [vmem:[#allocation9 + $0x58] sm:$0xff]  ;;  %v826_v63 = vld [vmem:[#allocation9 + $0x140] sm:$0xff] }
  0x5d   :  { %359 = vmatprep.mubr.f32.mxu0 %v1321_v3  ;;  %978 = vmatpush1.msk.msra.mxu0 %vm282_vm2, %v274_v6  ;;  %v648_v6 = vld [vmem:[#allocation7 + $0x120] sm:$0xff]  ;;  %v828_v0 = vld [vmem:[#allocation9 + $0x150] sm:$0xff] }
  0x5e   :  { %1096 = vmatprep.subr.bf16.mxu0 %v1095_v14  ;;  %v1133_v10 = vpack.c.bf16 %v650_v7, %v648_v6  ;;  %v657_v14 = vld [vmem:[#allocation7 + $0x168] sm:$0xff]  ;;  %v793_v6 = vld [vmem:[#allocation9 + $0x38] sm:$0xff] }
  0x5f   :  { %v1139_v17 = vpack.c.bf16 %v659_v15, %v657_v14  ;;  %v794_v15 = vld [vmem:[#allocation9 + $0x40] sm:$0xff] }
  0x60   :  { %979 = vmatmul.mubr.msk.f32.vlgmr.msra.gmra.mrb[2].mxu0 %vm278_vm3, %v273_v50  ;;  %v1119_v50 = vpack.c.bf16 %v639_v48, %v637_v47  ;;  %v1083_v48 = vpack.c.bf16 %v256_v46, %v252_v45  ;;  %v814_v46 = vld [vmem:[#allocation9 + $0xe0] sm:$0xff] }
  0x61   :  { %1098 = vmatpush1.bf16.msra.mxu0 %v1097_v18  ;;  %v656_v18 = vld [vmem:[#allocation7 + $0x160] sm:$0xff] }
  0x62   :  { %1100 = vmatprep.subr.bf16.mxu0 %v1099_v19  ;;  %v658_v19 = vld [vmem:[#allocation7 + $0x170] sm:$0xff] }
  0x63   :  { %v1141_v22 = vpack.c.bf16 %v658_v19, %v656_v18  ;;  %v801_v18 = vld [vmem:[#allocation9 + $0x78] sm:$0xff] }
  0x65   :  { %1102 = vmatpush1.bf16.msra.mxu0 %v1101_v24  ;;  %v660_v24 = vld [vmem:[#allocation7 + $0x180] sm:$0xff] }
  0x66   :  { %1104 = vmatprep.subr.bf16.mxu0 %v1103_v25  ;;  %v662_v25 = vld [vmem:[#allocation7 + $0x190] sm:$0xff] }
 0x12f   :  { %v191_v30 = vpop.f32.mrb[0].mxu0 }
 0x130   :  { %v195_v31 = vadd.f32 %v191_v30, %v107_v29  ;;  %v1038_v32 = vpop.f32.mrb[1].mxu0  ;;  %v627_v29 = vld [vmem:[#allocation7 + $0x78] sm:$0xff]  ;;  %v1105_v30 = vpack.c.bf16 %v622_v27, %v620_v26  ;;  %v665_v26 = vld [vmem:[#allocation7 + $0x1a8] sm:$0xff] }
 0x131   :  { %v624_v32 = vld [vmem:[#allocation7 + $0x60] sm:$0xff]  ;;  %v667_v27 = vld [vmem:[#allocation7 + $0x1b8] sm:$0xff] }
 0x132   :  { %197 = vst.msk [vmem:[#allocation2] sm:$0xff] %vm105_vm0, %v195_v31  ;;  %v1107_v31 = vpack.c.bf16 %v627_v29, %v625_v28  ;;  %1106 = vmatpush1.bf16.msra.mxu0 %v1105_v30  ;;  %v1145_v28 = vpack.c.bf16 %v662_v25, %v660_v24  ;;  %v1147_v29 = vpack.c.bf16 %v667_v27, %v665_v26  ;;  %v664_v30 = vld [vmem:[#allocation7 + $0x1a0] sm:$0xff]  ;;  %v805_v24 = vld [vmem:[#allocation9 + $0x98] sm:$0xff] }
 0x133   :  { %v802_v27 = vld [vmem:[#allocation9 + $0x80] sm:$0xff] }
 0x134   :  { %1108 = vmatprep.subr.bf16.mxu0 %v1107_v31  ;;  %v666_v31 = vld [vmem:[#allocation7 + $0x1b0] sm:$0xff] }
 0x139   :  { %v201_v34 = vld [vmem:[#allocation2] sm:$0xff] }
 0x13a   :  { %v209_v35 = vadd.f32 %v974_v33, %v201_v34  ;;  %v626_v33 = vld [vmem:[#allocation7 + $0x70] sm:$0xff]  ;;  %v629_v34 = vld [vmem:[#allocation7 + $0x88] sm:$0xff] }
 0x13c   :  { %v210_v36 = vsel %vm105_vm0, %v209_v35, 0.0 }
 0x13d   :  { %211 = vadd.xlane.f32.xlu0 %v210_v36  ;;  %v1109_v36 = vpack.c.bf16 %v626_v33, %v624_v32  ;;  %v1149_v32 = vpack.c.bf16 %v666_v31, %v664_v30  ;;  %v809_v30 = vld [vmem:[#allocation9 + $0xb8] sm:$0xff] }
 0x13f   :  { %1110 = vmatpush1.bf16.msra.mxu0 %v1109_v36 }
 0x1ca   :  { %v212_v37 = vpop.xlane.xlu0 %211 }
 0x1cb   :  { %v214_v38 = vmul.f32 0.015625, %v212_v37 }
 0x1cd   :  { %v1522_v39 = vsub.f32 %v209_v35, %v214_v38  ;;  %v631_v35 = vld [vmem:[#allocation7 + $0x98] sm:$0xff]  ;;  %v628_v38 = vld [vmem:[#allocation7 + $0x80] sm:$0xff] }
 0x1ce   :  { %v1111_v37 = vpack.c.bf16 %v631_v35, %v629_v34 }
 0x1cf   :  { %v216_v40 = vmul.f32 %v1522_v39, %v1522_v39 }
 0x1d0   :  { %1112 = vmatprep.subr.bf16.mxu0 %v1111_v37  ;;  %v975_v37 = vld [vmem:[%s1584_s4] ss:$0 sm:$0xff] }
 0x1d1   :  { %v217_v41 = vsel %vm105_vm0, %v216_v40, 0.0  ;;  %v630_v40 = vld [vmem:[#allocation7 + $0x90] sm:$0xff] }
 0x1d2   :  { %218 = vadd.xlane.f32.xlu0 %v217_v41  ;;  %v633_v41 = vld [vmem:[#allocation7 + $0xa8] sm:$0xff]  ;;  %v1113_v43 = vpack.c.bf16 %v630_v40, %v628_v38  ;;  %v976_v40 = vld [vmem:[%s1585_s5] ss:$0 sm:$0xff] }
 0x1d3   :  { %v1115_v44 = vpack.c.bf16 %v635_v42, %v633_v41 }
 0x1d4   :  { %1114 = vmatpush1.bf16.msra.mxu0 %v1113_v43  ;;  %v243_v43 = vld [vmem:[#allocation5 + $0x10] sm:$0xff] }
 0x1d5   :  { %1116 = vmatprep.subr.bf16.mxu0 %v1115_v44  ;;  %v247_v44 = vld [vmem:[#allocation5 + $0x30] sm:$0xff] }
 0x1d6   :  { %v1081_v47 = vpack.c.bf16 %v247_v44, %v243_v43  ;;  %v817_v43 = vld [vmem:[#allocation9 + $0xf8] sm:$0xff] }
 0x1d8   :  { %1118 = vmatpush1.bf16.msra.mxu0 %v1117_v49  ;;  %v251_v49 = vld [vmem:[#allocation5 + $0x50] sm:$0xff] }
 0x1d9   :  { %1120 = vmatprep.subr.bf16.mxu0 %v1119_v50  ;;  %v255_v50 = vld [vmem:[#allocation5 + $0x70] sm:$0xff] }
 0x1dc   :  { %1122 = vmatpush1.bf16.msra.mxu0 %v1121_v55  ;;  %v259_v55 = vld [vmem:[#allocation5 + $0x90] sm:$0xff] }
 0x1dd   :  { %1124 = vmatprep.subr.bf16.mxu0 %v1123_v56  ;;  %v263_v56 = vld [vmem:[#allocation5 + $0xb0] sm:$0xff] }
 0x1de   :  { %v1089_v59 = vpack.c.bf16 %v263_v56, %v259_v55  ;;  %v1193_v55 = vpack.c.bf16 %v820_v53, %v818_v52 }
 0x1e0   :  { %1126 = vmatpush1.bf16.msra.mxu0 %v1125_v61  ;;  %v267_v61 = vld [vmem:[#allocation5 + $0xd0] sm:$0xff] }
 0x1e1   :  { %1128 = vmatprep.subr.bf16.mxu0 %v1127_v62  ;;  %v271_v62 = vld [vmem:[#allocation5 + $0xf0] sm:$0xff] }
 0x1e2   :  { %v1093_v1 = vpack.c.bf16 %v271_v62, %v267_v61  ;;  %v1197_v61 = vpack.c.bf16 %v824_v58, %v822_v57 }
 0x1e4   :  { %1130 = vmatpush1.bf16.msra.mxu0 %v1129_v4  ;;  %v786_v4 = vld [vmem:[#allocation9] sm:$0xff] }
 0x1e5   :  { %1132 = vmatprep.subr.bf16.mxu0 %v1131_v5  ;;  %v791_v5 = vld [vmem:[#allocation9 + $0x28] sm:$0xff] }
 0x1e6   :  { %v1163_v8 = vpack.c.bf16 %v793_v6, %v791_v5  ;;  %v668_v6 = vld [vmem:[#allocation7 + $0x1c0] sm:$0xff] }
 0x1e8   :  { %1134 = vmatpush1.bf16.msra.mxu0 %v1133_v10  ;;  %v792_v10 = vld [vmem:[#allocation9 + $0x30] sm:$0xff] }
 0x1e9   :  { %1136 = vmatprep.subr.bf16.mxu0 %v1135_v11  ;;  %v795_v11 = vld [vmem:[#allocation9 + $0x48] sm:$0xff]  ;;  %v1165_v13 = vpack.c.bf16 %v792_v10, %v790_v9  ;;  %v833_v10 = vld [vmem:[#allocation9 + $0x178] sm:$0xff] }
 0x1ea   :  { %v1167_v14 = vpack.c.bf16 %v797_v12, %v795_v11  ;;  %v830_v11 = vld [vmem:[#allocation9 + $0x160] sm:$0xff] }
 0x1ec   :  { %1138 = vmatpush1.bf16.msra.mxu0 %v1137_v16  ;;  %v796_v16 = vld [vmem:[#allocation9 + $0x50] sm:$0xff] }
 0x1ed   :  { %1140 = vmatprep.subr.bf16.mxu0 %v1139_v17  ;;  %v799_v17 = vld [vmem:[#allocation9 + $0x68] sm:$0xff]  ;;  %v1169_v19 = vpack.c.bf16 %v796_v16, %v794_v15 }
 0x1ee   :  { %v1171_v20 = vpack.c.bf16 %v801_v18, %v799_v17  ;;  %v673_v16 = vld [vmem:[#allocation7 + $0x1e8] sm:$0xff]  ;;  %v675_v17 = vld [vmem:[#allocation7 + $0x1f8] sm:$0xff] }
 0x1ef   :  { %v1155_v18 = vpack.c.bf16 %v675_v17, %v673_v16 }
 0x1f0   :  { %1142 = vmatpush1.bf16.msra.mxu0 %v1141_v22  ;;  %v800_v22 = vld [vmem:[#allocation9 + $0x70] sm:$0xff] }
 0x1f1   :  { %1144 = vmatprep.subr.bf16.mxu0 %v1143_v23  ;;  %v803_v23 = vld [vmem:[#allocation9 + $0x88] sm:$0xff]  ;;  %v1173_v25 = vpack.c.bf16 %v800_v22, %v798_v21 }
 0x1f2   :  { %v1175_v26 = vpack.c.bf16 %v805_v24, %v803_v23  ;;  %v835_v21 = vld [vmem:[#allocation9 + $0x188] sm:$0xff]  ;;  %v837_v23 = vld [vmem:[#allocation9 + $0x198] sm:$0xff]  ;;  %v834_v24 = vld [vmem:[#allocation9 + $0x180] sm:$0xff] }
 0x1f4   :  { %1146 = vmatpush1.bf16.msra.mxu0 %v1145_v28  ;;  %v804_v28 = vld [vmem:[#allocation9 + $0x90] sm:$0xff] }
 0x1f5   :  { %1148 = vmatprep.subr.bf16.mxu0 %v1147_v29  ;;  %v807_v29 = vld [vmem:[#allocation9 + $0xa8] sm:$0xff]  ;;  %v1177_v31 = vpack.c.bf16 %v804_v28, %v802_v27 }
 0x1f6   :  { %v839_v28 = vld [vmem:[#allocation9 + $0x1a8] sm:$0xff] }
 0x1f8   :  { %1150 = vmatpush1.bf16.msra.mxu0 %v1149_v32  ;;  %v1179_v32 = vpack.c.bf16 %v809_v30, %v807_v29  ;;  %v841_v29 = vld [vmem:[#allocation9 + $0x1b8] sm:$0xff] }
 0x1f9   :  { %v1211_v30 = vpack.c.bf16 %v841_v29, %v839_v28 }
 0x25f   :  { %v219_v33 = vpop.xlane.xlu0 %218 }
 0x260   :  { %v220_v34 = vmul.f32 0.015625, %v219_v33  ;;  %v806_v33 = vld [vmem:[#allocation9 + $0xa0] sm:$0xff] }
 0x262   :  { %v221_v35 = vadd.f32 1e-05, %v220_v34  ;;  %v808_v34 = vld [vmem:[#allocation9 + $0xb0] sm:$0xff] }
 0x264   :  { %1238 = vrsqrt.f32 %v221_v35  ;;  %v811_v35 = vld [vmem:[#allocation9 + $0xc8] sm:$0xff] }
 0x26e   :  { %v1239_v36 = vpop.eup %1238 }
 0x26f   :  { %v223_v38 = vmul.f32 %v1239_v36, %v1522_v39  ;;  %v1085_v39 = vpack.c.bf16 %v255_v50, %v251_v49  ;;  %v813_v36 = vld [vmem:[#allocation9 + $0xd8] sm:$0xff] }
 0x270   :  { %v821_v49 = vld [vmem:[#allocation9 + $0x118] sm:$0xff] }
 0x271   :  { %v231_v41 = vmul.f32 %v975_v37, %v223_v38  ;;  %v1181_v37 = vpack.c.bf16 %v808_v34, %v806_v33  ;;  %v1183_v38 = vpack.c.bf16 %v813_v36, %v811_v35  ;;  %v843_v33 = vld [vmem:[#allocation9 + $0x1c8] sm:$0xff]  ;;  %v845_v35 = vld [vmem:[#allocation9 + $0x1d8] sm:$0xff] }
 0x272   :  { %v1215_v36 = vpack.c.bf16 %v845_v35, %v843_v33 }
 0x273   :  { %v239_v42 = vadd.f32 %v976_v40, %v231_v41  ;;  %v810_v40 = vld [vmem:[#allocation9 + $0xc0] sm:$0xff]  ;;  %v812_v41 = vld [vmem:[#allocation9 + $0xd0] sm:$0xff] }
 0x274   :  { %v1185_v44 = vpack.c.bf16 %v812_v41, %v810_v40  ;;  %v847_v41 = vld [vmem:[#allocation9 + $0x1e8] sm:$0xff] }
 0x275   :  { %1240 = vtanh.f32 %v239_v42  ;;  %v815_v42 = vld [vmem:[#allocation9 + $0xe8] sm:$0xff] }
 0x276   :  { %v1187_v45 = vpack.c.bf16 %v817_v43, %v815_v42  ;;  %v849_v42 = vld [vmem:[#allocation9 + $0x1f8] sm:$0xff] }
 0x277   :  { %v1219_v43 = vpack.c.bf16 %v849_v42, %v847_v41  ;;  %v985_v41 = vld [vmem:[#allocation3] ss:$0 sm:$0xff] }
 0x27f   :  { %v1241_v51 = vpop.eup %1240 }
 0x280   :  { %983 = vmatmul.mubr.msk.f32.vlgmr.msra.gmra.mrb[2].mxu1 %vm105_vm0, %v1241_v51 }
 0x281   :  { %1082 = vmatpush1.bf16.msra.mxu1 %v1081_v47  ;;  %575 = vmatprep.mubr.f32.mxu1 %v1321_v3  ;;  %v788_v3 = vld [vmem:[#allocation9 + $0x10] sm:$0xff] }
 0x282   :  { %1084 = vmatprep.subr.bf16.mxu1 %v1083_v48  ;;  %v1161_v7 = vpack.c.bf16 %v788_v3, %v786_v4  ;;  %v816_v47 = vld [vmem:[#allocation9 + $0xf0] sm:$0xff]  ;;  %v819_v48 = vld [vmem:[#allocation9 + $0x108] sm:$0xff]  ;;  %v671_v3 = vld [vmem:[#allocation7 + $0x1d8] sm:$0xff] }
 0x283   :  { %v1189_v50 = vpack.c.bf16 %v816_v47, %v814_v46  ;;  %v669_v4 = vld [vmem:[#allocation7 + $0x1c8] sm:$0xff]  ;;  %v584_v47 = vlaneseq }
 0x284   :  { %v1151_v5 = vpack.c.bf16 %v671_v3, %v669_v4 }
 0x285   :  { %1086 = vmatpush1.bf16.msra.mxu1 %v1085_v39  ;;  %v823_v39 = vld [vmem:[#allocation9 + $0x128] sm:$0xff] }
 0x286   :  { %1088 = vmatprep.subr.bf16.mxu1 %v1087_v54  ;;  %v825_v54 = vld [vmem:[#allocation9 + $0x138] sm:$0xff]  ;;  %1152 = vmatprep.subr.bf16.mxu0 %v1151_v5 }
 0x287   :  { %v1195_v56 = vpack.c.bf16 %v825_v54, %v823_v39 }
 0x289   :  { %1090 = vmatpush1.bf16.msra.mxu1 %v1089_v59  ;;  %v827_v59 = vld [vmem:[#allocation9 + $0x148] sm:$0xff] }
 0x28a   :  { %1092 = vmatprep.subr.bf16.mxu1 %v1091_v60  ;;  %v829_v60 = vld [vmem:[#allocation9 + $0x158] sm:$0xff] }
 0x28b   :  { %v1199_v62 = vpack.c.bf16 %v829_v60, %v827_v59 }
 0x28d   :  { %1094 = vmatpush1.bf16.msra.mxu1 %v1093_v1  ;;  %v1201_v1 = vpack.c.bf16 %v828_v0, %v826_v63 }
 0x28e   :  { %1160 = vmatprep.subr.bf16.mxu1 %v1159_v2  ;;  %v1559_v2 = vpop.f32.mrb[2].mxu0 }
 0x28f   :  { %v363_v12 = vpop.f32.mrb[3].mxu0 }
 0x290   :  { %984 = vmatmul.mubr.msk.f32.vlgmr.msra.gmra.mrb[0].mxu1 %vm105_vm0, %v1241_v51  ;;  %v1191_v51 = vpack.c.bf16 %v821_v49, %v819_v48  ;;  %v585_v48 = vshrl.u32 %v584_v47, 7 }
 0x291   :  { %1162 = vmatpush1.bf16.msra.mxu1 %v1161_v7  ;;  %v670_v7 = vld [vmem:[#allocation7 + $0x1d0] sm:$0xff] }
 0x292   :  { %1164 = vmatprep.subr.bf16.mxu1 %v1163_v8  ;;  %v831_v8 = vld [vmem:[#allocation9 + $0x168] sm:$0xff]  ;;  %v1153_v9 = vpack.c.bf16 %v670_v7, %v668_v6  ;;  %v586_v49 = vsub.s32 0, %v585_v48 }
 0x294   :  { %1154 = vmatpush1.bf16.msra.mxu0 %v1153_v9  ;;  %v761_v9 = vld [vmem:[%s1591_s11] sm:$0x3] }
 0x295   :  { %1166 = vmatpush1.bf16.msra.mxu1 %v1165_v13  ;;  %v1203_v13 = vpack.c.bf16 %v833_v10, %v831_v8  ;;  %1156 = vmatprep.subr.bf16.mxu0 %v1155_v18 }
 0x296   :  { %1168 = vmatprep.subr.bf16.mxu1 %v1167_v14  ;;  %v832_v14 = vld [vmem:[#allocation9 + $0x170] sm:$0xff] }
 0x297   :  { %v1205_v15 = vpack.c.bf16 %v832_v14, %v830_v11 }
 0x299   :  { %1170 = vmatpush1.bf16.msra.mxu1 %v1169_v19  ;;  %v672_v19 = vld [vmem:[#allocation7 + $0x1e0] sm:$0xff] }
 0x29a   :  { %1172 = vmatprep.subr.bf16.mxu1 %v1171_v20  ;;  %v674_v20 = vld [vmem:[#allocation7 + $0x1f0] sm:$0xff] }
 0x29b   :  { %v1157_v22 = vpack.c.bf16 %v674_v20, %v672_v19 }
 0x29d   :  { %1174 = vmatpush1.bf16.msra.mxu1 %v1173_v25  ;;  %v836_v25 = vld [vmem:[#allocation9 + $0x190] sm:$0xff]  ;;  %1158 = vmatpush1.bf16.msra.mxu0 %v1157_v22 }
 0x29e   :  { %1176 = vmatprep.subr.bf16.mxu1 %v1175_v26  ;;  %v1207_v26 = vpack.c.bf16 %v837_v23, %v835_v21  ;;  %v1209_v27 = vpack.c.bf16 %v836_v25, %v834_v24  ;;  %v850_v21 = vld [vmem:[%s1594_s14] sm:$0x3]  ;;  %s1322_s14 = smov 1  }
 0x29f   :  { %v855_v23 = vrot.slane %v850_v21, %v586_v49  ;;  %v935_v25 = vld [vmem:[%s1595_s15] sm:$0x3] }
 0x2a0   :  { %v940_v29 = vrot.slane %v935_v25, %v586_v49 }
 0x2a1   :  { %1178 = vmatpush1.bf16.msra.mxu1 %v1177_v31  ;;  %v838_v31 = vld [vmem:[#allocation9 + $0x1a0] sm:$0xff] }
 0x2a2   :  { %1180 = vmatprep.subr.bf16.mxu1 %v1179_v32  ;;  %v840_v32 = vld [vmem:[#allocation9 + $0x1b0] sm:$0xff] }
 0x2a3   :  { %v1213_v34 = vpack.c.bf16 %v840_v32, %v838_v31 }
 0x2a5   :  { %1182 = vmatpush1.bf16.msra.mxu1 %v1181_v37  ;;  %v842_v37 = vld [vmem:[#allocation9 + $0x1c0] sm:$0xff] }
 0x2a6   :  { %1184 = vmatprep.subr.bf16.mxu1 %v1183_v38  ;;  %v844_v38 = vld [vmem:[#allocation9 + $0x1d0] sm:$0xff] }
 0x2a7   :  { %v1217_v40 = vpack.c.bf16 %v844_v38, %v842_v37  ;;  %v986_v37 = vld [vmem:[#allocation4] ss:$0 sm:$0xff] }
 0x2a9   :  { %1186 = vmatpush1.bf16.msra.mxu1 %v1185_v44  ;;  %v846_v44 = vld [vmem:[#allocation9 + $0x1e0] sm:$0xff] }
 0x2aa   :  { %1188 = vmatprep.subr.bf16.mxu1 %v1187_v45  ;;  %v848_v45 = vld [vmem:[#allocation9 + $0x1f0] sm:$0xff] }
 0x2ab   :  { %v1221_v46 = vpack.c.bf16 %v848_v45, %v846_v44 }
 0x2ad   :  { %1190 = vmatpush1.bf16.msra.mxu1 %v1189_v50  ;;  %v582_v50 = vld [vmem:[%s1588_s8] sm:$0xf] }
 0x2ae   :  { %1192 = vmatprep.subr.bf16.mxu1 %v1191_v51  ;;  %v590_v51 = vsub.s32 1, %v585_v48  ;;  %v587_v52 = vrot.slane %v582_v50, %v586_v49 }
 0x2b0   :  { %v591_v39 = vrot.slane %v582_v50, %v590_v51  ;;  %v770_v16 = vrot.slane %v761_v9, %v590_v51  ;;  %v859_v24 = vrot.slane %v850_v21, %v590_v51  ;;  %v944_v31 = vrot.slane %v935_v25, %v590_v51 }
 0x2b1   :  { %1194 = vmatpush1.bf16.msra.mxu1 %v1193_v55 }
 0x2b2   :  { %1196 = vmatprep.subr.bf16.mxu1 %v1195_v56 }
 0x2b5   :  { %1198 = vmatpush1.bf16.msra.mxu1 %v1197_v61  ;;  %v594_v61 = vsub.s32 2, %v585_v48 }
 0x2b6   :  { %1200 = vmatprep.subr.bf16.mxu1 %v1199_v62  ;;  %v598_v62 = vsub.s32 3, %v585_v48 }
 0x2b7   :  { %v595_v63 = vrot.slane %v582_v50, %v594_v61 }
 0x2b8   :  { %v599_v0 = vrot.slane %v582_v50, %v598_v62 }
 0x2b9   :  { %1202 = vmatpush1.bf16.msra.mxu1 %v1201_v1 }
 0x2ba   :  { %1204 = vmatprep.subr.bf16.mxu1 %v1203_v13  ;;  %v766_v13 = vrot.slane %v761_v9, %v586_v49 }
 0x2bd   :  { %1206 = vmatpush1.bf16.msra.mxu1 %v1205_v15 }
 0x2be   :  { %1208 = vmatprep.subr.bf16.mxu1 %v1207_v26 }
 0x2c1   :  { %1210 = vmatpush1.bf16.msra.mxu1 %v1209_v27 }
 0x2c2   :  { %1212 = vmatprep.subr.bf16.mxu1 %v1211_v30 }
 0x2c5   :  { %1214 = vmatpush1.bf16.msra.mxu1 %v1213_v34 }
 0x2c6   :  { %1216 = vmatprep.subr.bf16.mxu1 %v1215_v36 }
 0x2c9   :  { %1218 = vmatpush1.bf16.msra.mxu1 %v1217_v40 }
 0x2ca   :  { %1220 = vmatprep.subr.bf16.mxu1 %v1219_v43 }
 0x2cd   :  { %1222 = vmatpush1.bf16.msra.mxu1 %v1221_v46 }
 0x353   :  { %v506_v53 = vpop.f32.mrb[2].mxu1 }
 0x354   :  { %v507_v54 = vadd.f32 %v506_v53, %v1559_v2  ;;  %v508_v55 = vpop.f32.mrb[3].mxu1  ;;  %v676_v2 = vld [vmem:[%s1590_s10] sm:$0x3] }
 0x355   :  { %v509_v56 = vadd.f32 %v508_v55, %v363_v12  ;;  %v681_v8 = vrot.slane %v676_v2, %v586_v49  ;;  %v685_v10 = vrot.slane %v676_v2, %v590_v51 }
 0x356   :  { %v604_v57 = vadd.f32 %v587_v52, %v507_v54 }
 0x357   :  { %v605_v58 = vadd.f32 %v591_v39, %v509_v56 }
 0x358   :  { %v608_v60 = vmax.f32 %v604_v57, 0.0 }
 0x359   :  { %v609_v59 = vmax.f32 %v605_v58, 0.0 }
 0x35b   :  { %752 = vmatprep.mubr.f32.mxu0 %v609_v59 }
 0x35c   :  { %753 = vmatmul.mubr.f32.vlgmr.msra.gmra.mrb[4].mxu0 %v608_v60 }
 0x363   :  { %v577_v1 = vpop.f32.mrb[0].mxu1 }
 0x364   :  { %v606_v4 = vadd.f32 %v595_v63, %v577_v1  ;;  %v579_v3 = vpop.f32.mrb[1].mxu1 }
 0x365   :  { %v607_v5 = vadd.f32 %v599_v0, %v579_v3 }
 0x366   :  { %v610_v7 = vmax.f32 %v606_v4, 0.0 }
 0x367   :  { %v611_v6 = vmax.f32 %v607_v5, 0.0 }
 0x369   :  { %926 = vmatprep.mubr.f32.mxu1 %v611_v6 }
 0x36a   :  { %927 = vmatmul.mubr.f32.vlgmr.msra.gmra.mrb[4].mxu1 %v610_v7 }
 0x42f   :  { %v754_v11 = vpop.f32.mrb[4].mxu0 }
 0x430   :  { %v755_v12 = vadd.f32 %v754_v11, %v681_v8  ;;  %v756_v14 = vpop.f32.mrb[5].mxu0 }
 0x431   :  { %v757_v15 = vadd.f32 %v756_v14, %v685_v10 }
 0x432   :  { %v759_v17 = vmax.f32 %v755_v12, 0.0 }
 0x433   :  { %v760_v18 = vmax.f32 %v757_v15, 0.0 }
 0x434   :  { %v773_v19 = vmul.f32 %v766_v13, %v759_v17 }
 0x435   :  { %v774_v20 = vmul.f32 %v770_v16, %v760_v18 }
 0x437   :  { %v775_v22 = vadd.f32 %v774_v20, %v773_v19 }
 0x43d   :  { %v928_v26 = vpop.f32.mrb[4].mxu1 }
 0x43e   :  { %v929_v27 = vadd.f32 %v928_v26, %v855_v23  ;;  %v930_v28 = vpop.f32.mrb[5].mxu1 }
 0x43f   :  { %v931_v30 = vadd.f32 %v930_v28, %v859_v24 }
 0x440   :  { %v933_v32 = vmax.f32 %v929_v27, 0.0 }
 0x441   :  { %v934_v33 = vmax.f32 %v931_v30, 0.0 }
 0x442   :  { %v947_v34 = vmul.f32 %v940_v29, %v933_v32 }
 0x443   :  { %v948_v35 = vmul.f32 %v944_v31, %v934_v33 }
 0x445   :  { %v949_v36 = vadd.f32 %v948_v35, %v947_v34 }
 0x447   :  { %950 = vadd.xlane.f32.xlu1 %v949_v36 }
 0x44b   :  { %776 = vadd.xlane.f32.xlu1 %v775_v22 }
 0x4d4   :  { %v951_v38 = vpop.xlane.xlu1 %950 }
 0x4d5   :  { %v959_v40 = vadd.f32 %v986_v37, %v951_v38 }
 0x4d7   :  { %961 = vrot.lane.b32.xlu0 %v959_v40, %s1322_s14 }
 0x4d8   :  { %v777_v42 = vpop.xlane.xlu1 %776 }
 0x4d9   :  { %v785_v43 = vadd.f32 %v985_v41, %v777_v42 }
 0x549   :  { %v962_v44 = vpop.permute.xlu0 %961 }
 0x54a   :  { %v965_v45 = vsel %vm964_vm4, %v785_v43, %v962_v44 }
 0x54b   :  { %967 = vst.msk [vmem:[%s1596_s17] sm:$0xff] %vm966_vm5, %v965_v45 }
 0x54c   :  { %972 = vsyncpa [#allocation6], 1 }
 0x54d   :  { %973 = vsyncpa [#allocation8], 1 }

</bundles_post_ra>
